<compile_context>
chip_gen: v7x
topology: tpu7x:2x2x1
jax: 0.10.0
libtpu: 0.0.40
codegen_flags: <defaults>
</compile_context>

<pallas_src>
import math

import numpy as np
import jax
import jax.numpy as jnp
from jax.experimental import pallas as pl
from jax.experimental.pallas import tpu as pltpu


def _round_up(x, m):
    return ((x + m - 1) // m) * m


def _fit_sin2pi_coeffs(degree=11):
    """Odd-polynomial coefficients c such that
         sin(2*pi*r) ~= sum_k c[k] * r**(2k+1)   for r in [-0.5, 0.5].
    Fit once at import time in float64 on Chebyshev-distributed nodes
    (near-minimax; |err| ~ a few 1e-7, far below the kernel's f32 noise floor)."""
    n = 4096
    theta = (np.arange(n) + 0.5) * np.pi / n
    u = np.cos(theta)                        # u = 2*r, nodes in (-1, 1)
    powers = np.arange(1, degree + 1, 2)     # 1, 3, ..., degree
    A = np.power.outer(u, powers)
    y = np.sin(np.pi * u)
    c_u, *_ = np.linalg.lstsq(A, y, rcond=None)
    # Substitute u = 2r: the coefficient of r**p picks up a factor 2**p.
    return tuple(float(c) * (2.0 ** int(p)) for c, p in zip(c_u, powers))


_SIN2PI_C = _fit_sin2pi_coeffs()   # (c1, c3, c5, c7, c9, c11)


def _lff_kernel(x_ref, w_ref, b_ref, o_ref):
    # x_ref: (tb, K), w_ref: (K, tn), b_ref: (1, tn), o_ref: (tb, tn)
    # MXU matmul with f32 accumulation; K is tiny, so the binding path is the
    # polynomial-sin epilogue (pure VPU ops) + the lane-dense store.
    t = jnp.dot(x_ref[...], w_ref[...], preferred_element_type=jnp.float32)
    t = t + b_ref[...]
    # sin(2*pi*t) has period 1 in t: reduce to r in [-0.5, 0.5).
    r = t - jnp.floor(t + 0.5)
    r2 = r * r
    c1, c3, c5, c7, c9, c11 = _SIN2PI_C
    p = c11
    p = p * r2 + c9
    p = p * r2 + c7
    p = p * r2 + c5
    p = p * r2 + c3
    p = p * r2 + c1
    o_ref[...] = (r * p).astype(o_ref.dtype)


def prepare_lff_params(weight, bias):
    """One-time parameter prep -- keep OUT of the per-call hot path.

    Transposes W to (input_dim, output_dim) and reshapes the bias to
    (1, output_dim).  No 2*pi fold (the polynomial epilogue consumes t
    directly) and no lane padding (full-dim feature blocks avoid an extra
    pad+slice HBM pass).  Returns (w_prep, b_prep, output_dim)."""
    output_dim, input_dim = weight.shape
    w_t = jnp.asarray(weight, jnp.float32).T              # (K, N)
    b = jnp.asarray(bias, jnp.float32).reshape(1, output_dim)
    return w_t, b, output_dim


def _default_block_batch(B):
    # Per-chip batch-tile cap: 128 MiB-VMEM chips (v5e/v6e) amortize the
    # per-grid-step overhead with 1024-row tiles; 64 MiB chips (v7x) keep 512.
    cap = 512
    try:
        if pltpu.get_tpu_info().vmem_capacity_bytes >= (100 << 20):
            cap = 1024
    except Exception:
        pass
    if B <= cap:
        return B
    # Balanced tiles with an even tile count: keeps v7x's 2 TensorCores evenly
    # loaded (e.g. B=1037 -> 4 x 264 rows instead of 512 + 512 + 13).
    n_tiles = _round_up(pl.cdiv(B, cap), 2)
    return _round_up(pl.cdiv(B, n_tiles), 8)


def lff_forward(x, w_prep, b_prep, output_dim, *, block_batch=None, block_n=None,
                out_dtype=None):
    """x: (B, input_dim) f32; w_prep/b_prep from prepare_lff_params."""
    B, K = x.shape
    out_dtype = x.dtype if out_dtype is None else out_dtype

    if block_batch is None:
        block_batch = _default_block_batch(B)
    if block_n is None:
        # Full feature dim when it fits in one tile (legal even if not a
        # multiple of 128 -- masked tail stores beat pad+slice); otherwise
        # 2048-lane (128-multiple) tiles.
        block_n = output_dim if output_dim <= 2048 else 2048

    # Feature axis OUTER so W/bias blocks are reused (no DMA refetch) across
    # consecutive batch steps; both axes are independent -> "parallel".
    grid = (pl.cdiv(output_dim, block_n), pl.cdiv(B, block_batch))

    # Per-step VMEM: double-buffered x, W, bias, out tiles (+ headroom); cap at
    # 48 MiB so v7x (64 MiB physical) keeps headroom for internal scratch.
    per_step_bytes = 4 * (block_batch * K + K * block_n + block_n
                          + block_batch * block_n)
    vmem_limit = int(min(max(2 * per_step_bytes + (4 << 20), 32 << 20), 48 << 20))

    return pl.pallas_call(
        _lff_kernel,
        out_shape=jax.ShapeDtypeStruct((B, output_dim), out_dtype),
        grid_spec=pltpu.PrefetchScalarGridSpec(
            num_scalar_prefetch=0,
            grid=grid,
            in_specs=[
                pl.BlockSpec((block_batch, K), lambda j, i: (i, 0)),
                pl.BlockSpec((K, block_n), lambda j, i: (0, j)),
                pl.BlockSpec((1, block_n), lambda j, i: (0, j)),
            ],
            out_specs=pl.BlockSpec((block_batch, block_n), lambda j, i: (i, j)),
        ),
        compiler_params=pltpu.CompilerParams(
            dimension_semantics=("parallel", "parallel"),
            vmem_limit_bytes=vmem_limit,
        ),
        cost_estimate=pl.CostEstimate(
            flops=2 * B * K * output_dim + 16 * B * output_dim,
            transcendentals=0,
            bytes_accessed=4 * (B * K + K * output_dim + output_dim)
                           + B * output_dim * jnp.dtype(out_dtype).itemsize,
        ),
    )(x, w_prep, b_prep)


def init_lff_params(key, input_dim, mapping_size, scale=1.0):
    """Deterministic init matching the PyTorch module's __init__."""
    output_dim = mapping_size * 2
    kw, kb = jax.random.split(key)
    bound = scale / input_dim
    weight = jax.random.uniform(
        kw, (output_dim, input_dim), dtype=jnp.float32, minval=-bound, maxval=bound
    )
    bias = jax.random.uniform(
        kb, (output_dim,), dtype=jnp.float32, minval=-1.0, maxval=1.0
    )
    return weight, bias


def _reference(x, weight, bias):
    # Plain-JAX mirror of the PyTorch forward.
    return jnp.sin(2.0 * math.pi * (x @ weight.T + bias))


if __name__ == "__main__":
    key = jax.random.PRNGKey(0)
    k_x, k_p, k_x2, k_p2 = jax.random.split(key, 4)

    # --- Small check (matches the module's typical usage scale) ---
    batch = 8
    input_dim = 16
    mapping_size = 16          # output_dim = 32 (masked tail store, no padding)
    x = jax.random.normal(k_x, (batch, input_dim), dtype=jnp.float32)
    weight, bias = init_lff_params(k_p, input_dim, mapping_size, scale=1.0)

    w_prep, b_prep, output_dim = prepare_lff_params(weight, bias)  # one-time prep
    out = lff_forward(x, w_prep, b_prep, output_dim)
    out = jax.block_until_ready(out)

    ref = _reference(x, weight, bias)
    assert out.shape == (batch, mapping_size * 2)
    assert jnp.allclose(out, ref, atol=2e-5, rtol=2e-5)

    # --- Larger check: exercises balanced batch tiling (multiple grid steps,
    # partial last block) and a non-128-multiple feature dim (192) stored
    # directly without padding. ---
    batch2 = 1037
    input_dim2 = 16
    mapping_size2 = 96         # output_dim = 192
    x2 = jax.random.normal(k_x2, (batch2, input_dim2), dtype=jnp.float32)
    weight2, bias2 = init_lff_params(k_p2, input_dim2, mapping_size2, scale=1.0)

    w_prep2, b_prep2, output_dim2 = prepare_lff_params(weight2, bias2)
    out2 = lff_forward(x2, w_prep2, b_prep2, output_dim2)
    out2 = jax.block_until_ready(out2)

    ref2 = _reference(x2, weight2, bias2)
    assert out2.shape == (batch2, mapping_size2 * 2)
    assert jnp.allclose(out2, ref2, atol=2e-5, rtol=2e-5)

    print("KERNEL_OK")
</pallas_src>

<mosaic_0001>
module attributes {stable_mosaic.version = 11 : i64} {
  func.func @_lff_kernel(%arg0: i32, %arg1: i32, %arg2: memref<8x16xf32, #tpu.memory_space<vmem>>, %arg3: memref<16x32xf32, #tpu.memory_space<vmem>>, %arg4: memref<1x32xf32, #tpu.memory_space<vmem>>, %arg5: memref<8x32xf32, #tpu.memory_space<vmem>>) attributes {dimension_semantics = [#tpu.dimension_semantics<parallel>, #tpu.dimension_semantics<parallel>], iteration_bounds = array<i64: 1, 1>, scalar_prefetch = 0 : i64, scratch_operands = 0 : i64, tpu.core_type = #tpu.core_type<tc>, window_params = [{transform_indices = @transform_0, window_bounds = array<i64: 8, 16>}, {transform_indices = @transform_1, window_bounds = array<i64: 16, 32>}, {transform_indices = @transform_2, window_bounds = array<i64: 1, 32>}, {transform_indices = @transform_3, window_bounds = array<i64: 8, 32>}]} {
    %c0 = arith.constant 0 : index
    %c0_0 = arith.constant 0 : index
    %0 = vector.load %arg2[%c0, %c0_0] : memref<8x16xf32, #tpu.memory_space<vmem>>, vector<8x16xf32>
    %c0_1 = arith.constant 0 : index
    %c0_2 = arith.constant 0 : index
    %1 = vector.load %arg3[%c0_1, %c0_2] : memref<16x32xf32, #tpu.memory_space<vmem>>, vector<16x32xf32>
    %cst = arith.constant dense<0.000000e+00> : vector<8x32xf32>
    %2 = tpu.matmul %0, %1, %cst {dimension_numbers = #tpu.dot_dimension_numbers<[1], [0], [0], [1], [0, 0, 1, 1], [], []>} : vector<8x16xf32>, vector<16x32xf32>, vector<8x32xf32> -> vector<8x32xf32>
    %c0_3 = arith.constant 0 : index
    %c0_4 = arith.constant 0 : index
    %3 = vector.load %arg4[%c0_3, %c0_4] : memref<1x32xf32, #tpu.memory_space<vmem>>, vector<1x32xf32>
    %4 = vector.broadcast %3 : vector<1x32xf32> to vector<8x32xf32>
    %5 = arith.addf %2, %4 : vector<8x32xf32>
    %cst_5 = arith.constant 5.000000e-01 : f32
    %6 = vector.broadcast %cst_5 : f32 to vector<8x32xf32>
    %7 = arith.addf %5, %6 : vector<8x32xf32>
    %8 = math.floor %7 : vector<8x32xf32>
    %9 = arith.subf %5, %8 : vector<8x32xf32>
    %10 = arith.mulf %9, %9 : vector<8x32xf32>
    %cst_6 = arith.constant -12.2688599 : f32
    %11 = vector.broadcast %cst_6 : f32 to vector<8x32xf32>
    %12 = arith.mulf %11, %10 : vector<8x32xf32>
    %cst_7 = arith.constant 41.203743 : f32
    %13 = vector.broadcast %cst_7 : f32 to vector<8x32xf32>
    %14 = arith.addf %12, %13 : vector<8x32xf32>
    %15 = arith.mulf %14, %10 : vector<8x32xf32>
    %cst_8 = arith.constant -76.579689 : f32
    %16 = vector.broadcast %cst_8 : f32 to vector<8x32xf32>
    %17 = arith.addf %15, %16 : vector<8x32xf32>
    %18 = arith.mulf %17, %10 : vector<8x32xf32>
    %cst_9 = arith.constant 81.596138 : f32
    %19 = vector.broadcast %cst_9 : f32 to vector<8x32xf32>
    %20 = arith.addf %18, %19 : vector<8x32xf32>
    %21 = arith.mulf %20, %10 : vector<8x32xf32>
    %cst_10 = arith.constant -41.3414192 : f32
    %22 = vector.broadcast %cst_10 : f32 to vector<8x32xf32>
    %23 = arith.addf %21, %22 : vector<8x32xf32>
    %24 = arith.mulf %23, %10 : vector<8x32xf32>
    %cst_11 = arith.constant 6.28318262 : f32
    %25 = vector.broadcast %cst_11 : f32 to vector<8x32xf32>
    %26 = arith.addf %24, %25 : vector<8x32xf32>
    %27 = arith.mulf %9, %26 : vector<8x32xf32>
    %c0_12 = arith.constant 0 : index
    %c0_13 = arith.constant 0 : index
    %28 = vector.load %arg5[%c0_12, %c0_13] : memref<8x32xf32, #tpu.memory_space<vmem>>, vector<8x32xf32>
    tpu.vector_store %arg5[%c0_12, %c0_13], %27 {strides = array<i32>} : memref<8x32xf32, #tpu.memory_space<vmem>>, vector<8x32xf32>,
    return
  }
  func.func @transform_0(%arg0: i32, %arg1: i32) -> (i32, i32) {
    %c0_i32 = arith.constant 0 : i32
    %c0_i32_0 = arith.constant 0 : i32
    return %arg1, %c0_i32 : i32, i32
  }
  func.func @transform_1(%arg0: i32, %arg1: i32) -> (i32, i32) {
    %c0_i32 = arith.constant 0 : i32
    %c0_i32_0 = arith.constant 0 : i32
    return %c0_i32, %arg0 : i32, i32
  }
  func.func @transform_2(%arg0: i32, %arg1: i32) -> (i32, i32) {
    %c0_i32 = arith.constant 0 : i32
    %c0_i32_0 = arith.constant 0 : i32
    return %c0_i32, %arg0 : i32, i32
  }
  func.func @transform_3(%arg0: i32, %arg1: i32) -> (i32, i32) {
    %c0_i32 = arith.constant 0 : i32
    return %arg1, %arg0 : i32, i32
  }
}

</mosaic_0001>

<bundles_post_ra>
// kernel: tpu_custom_call.1
= control target key start
LH: loop header
LB: loop body
LE: loop exit
PB: predicated region body
PF: predicated region fallthrough
CT: control target
= control target key end

     0   :  { %8 = vsyncpa [#allocation3], 0  ;;  %s327_s0 = inlined_call_operand.hbm [shape: f32[8,16], index: 0, kind: input, shape index: {}]   ;;  %s328_s1 = inlined_call_operand.hbm [shape: f32[16,32], index: 1, kind: input, shape index: {}]   ;;  %s329_s2 = inlined_call_operand.vmem [shape: f32[1,32], index: 2, kind: input, shape index: {}]   ;;  %s330_s3 = inlined_call_operand.hbm [shape: f32[8,32], index: 3, kind: output, shape index: {}]  }
   0x1   :  { %9 = vsyncpa [#allocation6], 0 }
   0x2   :  { %10 = vsyncpa [#allocation4], 0  ;;  %s253_s12 = smov [#allocation2]   ;;  %s254_s14 = smov [#allocation5]  }
   0x3   :  { %s17_s13 = sshll.u32 %s253_s12, 4  ;;  %s26_s15 = sshll.u32 %s254_s14, 4  ;;  %s18_s13 = int_to_ptr.vmem [resolvable:$true] %s17_s13  ;;  %s281_s15 = int_to_ptr.vmem [resolvable:$true] %s26_s15 }
   0x4   :  { %s181_s18 = scalar_lea.hbm %s327_s0, 128 }
   0x5   :  { %p182_p0 = scmp.ne.s32.totalorder %s327_s0, %s181_s18  ;;  %p185_p1 = scmp.lt.u32.totalorder %s181_s18, %s327_s0 }
   0x7   :  { %p187_p2 = pnand %p185_p1, %p182_p0 }
   0x9   :  { %190 = shalt.err (!%p187_p2)
}
   0xa   :  { %s191_s23 = scalar_lea.vmem %s18_s13, 128  ;;  %p196_p4 = scmp.lt.s32.totalorder %s18_s13, %s18_s13 }
   0xb   :  { %p192_p3 = scmp.ne.s32.totalorder %s18_s13, %s191_s23  ;;  %p197_p5 = scmp.lt.s32.totalorder %s191_s23, %s191_s23 }
   0xd   :  { %p198_p6 = por %p197_p5, %p196_p4 }
   0xf   :  { %p199_p7 = pnand %p198_p6, %p192_p3 }
  0x11   :  { %202 = shalt.err (!%p199_p7)
}
  0x12   :  { %20 = dma.hbm_to_vmem [thread:$0]  %s327_s0, 128, %s18_s13, [#allocation3]  }
  0x13   :  { %s203_s28 = scalar_lea.hbm %s328_s1, 256 }
  0x14   :  { %p204_p8 = scmp.ne.s32.totalorder %s328_s1, %s203_s28  ;;  %p207_p9 = scmp.lt.u32.totalorder %s203_s28, %s328_s1 }
  0x16   :  { %p209_p10 = pnand %p207_p9, %p204_p8 }
  0x18   :  { %212 = shalt.err (!%p209_p10)
}
  0x19   :  { %s213_s6 = scalar_lea.vmem %s281_s15, 256  ;;  %p218_p12 = scmp.lt.s32.totalorder %s281_s15, %s281_s15 }
  0x1a   :  { %p214_p11 = scmp.ne.s32.totalorder %s281_s15, %s213_s6  ;;  %p219_p13 = scmp.lt.s32.totalorder %s213_s6, %s213_s6 }
  0x1c   :  { %p220_p0 = por %p219_p13, %p218_p12 }
  0x1e   :  { %p221_p1 = pnand %p220_p0, %p214_p11 }
  0x20   :  { %224 = shalt.err (!%p221_p1)
}
  0x21   :  { %s255_s0 = smov 128   ;;  %s256_s7 = smov 8  }
  0x22   :  { %32 = dma.hbm_to_vmem [thread:$0]  %s328_s1, 256, %s281_s15, [#allocation6], %s255_s0, %s255_s0, %s256_s7  }
  0x23   :  { %247 = dma.done.wait [#allocation3], 128  }
  0x24   :  { %248 = vsyncadd [#allocation3], 4294967168 }
  0x25   :  { %249 = dma.done.wait [#allocation6], 256  }
  0x26   :  { %250 = vsyncadd [#allocation6], 4294967040  ;;  %v257_v0 = vmov 0.0|0.0   ;;  %vm258_vm0 = vmmov 0   ;;  %v259_v1 = vmov 0.0   ;;  %v42_v2 = vld [vmem:[#allocation5] sm:$0xff] }
  0x27   :  { %170 = vmatprep.subr.bf16.mxu0 %v257_v0  ;;  %167 = vmatprep.mubr.msk.f32.mxu0 %vm258_vm0, %v259_v1  ;;  %v43_v3 = vld [vmem:[#allocation5 + $0x8] sm:$0xff]  ;;  %v41_v5 = vld [vmem:[#allocation2] sm:$0xff]  ;;  %vm51_vm1 = vcmask 130048   ;;  %s260_s1 = smov [#allocation7]   ;;  %vm140_vm2 = vcmask 261120  }
  0x28   :  { %v171_v4 = vpack.c.bf16 %v43_v3, %v42_v2  ;;  %v158_v6 = vld [vmem:[%s329_s2] ss:$0 sm:$0xff]  ;;  %s148_s12 = sshll.u32 %s260_s1, 4  ;;  %s149_s12 = int_to_ptr.vmem [resolvable:$true] %s148_s12 }
  0x29   :  { %s225_s2 = scalar_lea.vmem %s149_s12, 128  ;;  %p230_p3 = scmp.lt.s32.totalorder %s149_s12, %s149_s12 }
  0x2a   :  { %172 = vmatpush3.bf16.msra.mxu0 %v171_v4  ;;  %p226_p2 = scmp.ne.s32.totalorder %s149_s12, %s225_s2  ;;  %p231_p4 = scmp.lt.s32.totalorder %s225_s2, %s225_s2 }
  0x2c   :  { %p232_p5 = por %p231_p4, %p230_p3 }
  0x2d   :  { %168 = vmatmul.mubr.msk.f32.vlgmr.msra.gmra.mrb[0].mxu0 %vm51_vm1, %v41_v5 }
  0x2e   :  { %p233_p6 = pnand %p232_p5, %p226_p2 }
 0x100   :  { %v121_v7 = vpop.f32.mrb[0].mxu0 }
 0x101   :  { %v122_v8 = vadd.f32 %v158_v6, %v121_v7  ;;  %v169_v9 = vpop.f32.mrb[1].mxu0 }
 0x103   :  { %v125_v10 = vadd.f32 0.5, %v122_v8 }
 0x105   :  { %v126_v11 = vfloor.f32 %v125_v10 }
 0x107   :  { %v127_v12 = vsub.f32 %v122_v8, %v126_v11 }
 0x109   :  { %v128_v13 = vmul.f32 %v127_v12, %v127_v12 }
 0x10b   :  { %v129_v14 = vmul.f32 -12.26886, %v128_v13 }
 0x10d   :  { %v130_v15 = vadd.f32 41.203743, %v129_v14 }
 0x10f   :  { %v131_v16 = vmul.f32 %v130_v15, %v128_v13 }
 0x111   :  { %v132_v17 = vadd.f32 -76.57969, %v131_v16 }
 0x113   :  { %v133_v18 = vmul.f32 %v132_v17, %v128_v13 }
 0x115   :  { %v134_v19 = vadd.f32 81.59614, %v133_v18 }
 0x117   :  { %v135_v20 = vmul.f32 %v134_v19, %v128_v13 }
 0x119   :  { %v136_v21 = vadd.f32 -41.34142, %v135_v20 }
 0x11b   :  { %v137_v22 = vmul.f32 %v136_v21, %v128_v13 }
 0x11d   :  { %v138_v23 = vadd.f32 6.2831826, %v137_v22 }
 0x11f   :  { %v139_v24 = vmul.f32 %v138_v23, %v127_v12 }
 0x121   :  { %141 = vst.msk [vmem:[#allocation7] sm:$0xff] %vm140_vm2, %v139_v24 }
 0x122   :  { %236 = shalt.err (!%p233_p6)
}
 0x123   :  { %s237_s15 = scalar_lea.hbm %s330_s3, 128 }
 0x124   :  { %p238_p7 = scmp.ne.s32.totalorder %s330_s3, %s237_s15  ;;  %p241_p8 = scmp.lt.u32.totalorder %s237_s15, %s330_s3 }
 0x126   :  { %p243_p9 = pnand %p241_p8, %p238_p7 }
 0x128   :  { %246 = shalt.err (!%p243_p9)
}
 0x129   :  { %151 = dma.vmem_to_hbm [thread:$0]  %s149_s12, 128, %s330_s3, [#allocation4]  }
 0x12a   :  { %251 = dma.done.wait [#allocation4], 128  }
 0x12b   :  { %252 = vsyncadd [#allocation4], 4294967168 }
 0x12c   :  { %155 = vsyncpa [#allocation3], 1 }
 0x12d   :  { %156 = vsyncpa [#allocation6], 1 }
 0x12e   :  { %157 = vsyncpa [#allocation4], 1 }

</bundles_post_ra>
